<compile_context>
chip_gen: v5e
topology: v5e:2x2
jax: 0.10.0
libtpu: 0.0.40
codegen_flags: <defaults>
</compile_context>

<pallas_src>
import jax
import jax.numpy as jnp
from jax.experimental import pallas as pl
from jax.experimental.pallas import tpu as pltpu

NEG_SLOPE = 0.01  # nn.LeakyReLU() default negative_slope
D_IN, D_H1, D_H2, D_OUT = 16, 128, 256, 512


def _leaky_relu(x):
    return jnp.where(x >= 0, x, NEG_SLOPE * x)


def generator_kernel(x_ref, w1_ref, b1_ref, w2_ref, b2_ref, w3_ref, b3_ref,
                     o_ref):
    # Layer 1: Linear(16 -> 128) + LeakyReLU   (Dropout = identity in eval)
    h1 = jnp.dot(x_ref[...], w1_ref[...],
                 preferred_element_type=jnp.float32) + b1_ref[...]
    h1 = _leaky_relu(h1)

    # Layer 2: Linear(128 -> 256) + LeakyReLU  (Dropout = identity in eval)
    h2 = jnp.dot(h1.astype(w2_ref.dtype), w2_ref[...],
                 preferred_element_type=jnp.float32) + b2_ref[...]
    h2 = _leaky_relu(h2)

    # Layer 3: Linear(256 -> 512)
    o_ref[...] = (jnp.dot(h2.astype(w3_ref.dtype), w3_ref[...],
                          preferred_element_type=jnp.float32)
                  + b3_ref[...]).astype(o_ref.dtype)


def generator_forward(x, params, *, batch_tile=256, use_bf16=None):
    """x: (B, 16) float32.  params: dict of (in,out)-transposed weights & biases."""
    B = x.shape[0]
    if use_bf16 is None:
        # Only worth casting once the batch is large enough to be MXU-bound.
        use_bf16 = B >= 1024
    compute_dtype = jnp.bfloat16 if use_bf16 else jnp.float32

    w1 = params["w1"].astype(compute_dtype)
    b1 = params["b1"].astype(compute_dtype)
    w2 = params["w2"].astype(compute_dtype)
    b2 = params["b2"].astype(compute_dtype)
    w3 = params["w3"].astype(compute_dtype)
    b3 = params["b3"].astype(compute_dtype)
    x_c = x.astype(compute_dtype)

    # Pick a sublane-aligned batch tile and pad B up to a multiple of it.
    b_min = ((B + 7) // 8) * 8
    tb = min(batch_tile, b_min)
    tb = ((tb + 7) // 8) * 8
    b_pad = pl.cdiv(b_min, tb) * tb
    if b_pad != B:
        x_c = jnp.pad(x_c, ((0, b_pad - B), (0, 0)))
    nb = b_pad // tb

    def const_spec(shape):
        # Constant block index -> operand DMA'd once, resident across batch tiles.
        return pl.BlockSpec(shape, lambda i: tuple(0 for _ in shape))

    out = pl.pallas_call(
        generator_kernel,
        out_shape=jax.ShapeDtypeStruct((b_pad, D_OUT), jnp.float32),
        grid=(nb,),
        in_specs=[
            pl.BlockSpec((tb, D_IN), lambda i: (i, 0)),
            const_spec(w1.shape), const_spec(b1.shape),
            const_spec(w2.shape), const_spec(b2.shape),
            const_spec(w3.shape), const_spec(b3.shape),
        ],
        out_specs=pl.BlockSpec((tb, D_OUT), lambda i: (i, 0)),
        compiler_params=pltpu.CompilerParams(
            dimension_semantics=("parallel",)),
    )(x_c, w1, b1, w2, b2, w3, b3)

    return out[:B] if b_pad != B else out


def init_params(key):
    """Deterministic init mimicking nn.Linear (uniform +/- 1/sqrt(fan_in)).

    Weights are stored transposed: (in_features, out_features)."""
    dims = [(D_IN, D_H1), (D_H1, D_H2), (D_H2, D_OUT)]
    params = {}
    for i, (fin, fout) in enumerate(dims, start=1):
        key, kw, kb = jax.random.split(key, 3)
        bound = 1.0 / jnp.sqrt(float(fin))
        params[f"w{i}"] = jax.random.uniform(
            kw, (fin, fout), jnp.float32, minval=-bound, maxval=bound)
        params[f"b{i}"] = jax.random.uniform(
            kb, (1, fout), jnp.float32, minval=-bound, maxval=bound)
    return params


def reference_forward(x, p):
    h = _leaky_relu(x @ p["w1"] + p["b1"])
    h = _leaky_relu(h @ p["w2"] + p["b2"])
    return h @ p["w3"] + p["b3"]


if __name__ == "__main__":
    key = jax.random.PRNGKey(0)
    key, kx1, kx2 = jax.random.split(key, 3)
    params = init_params(key)

    # Small-batch case (single tile).
    B = 8
    x = jax.random.normal(kx1, (B, D_IN), jnp.float32)
    out = jax.block_until_ready(generator_forward(x, params))
    ref = reference_forward(x, params)
    assert out.shape == (B, D_OUT), out.shape
    assert jnp.allclose(out, ref, atol=1e-4, rtol=1e-4), "mismatch (B=8)"

    # Multi-tile case with padding (exercises the batch grid + resident weights).
    B2 = 300
    x2 = jax.random.normal(kx2, (B2, D_IN), jnp.float32)
    out2 = jax.block_until_ready(
        generator_forward(x2, params, batch_tile=128, use_bf16=False))
    ref2 = reference_forward(x2, params)
    assert out2.shape == (B2, D_OUT), out2.shape
    assert jnp.allclose(out2, ref2, atol=1e-4, rtol=1e-4), "mismatch (B=300)"

    print("KERNEL_OK")
</pallas_src>

<mosaic_0001>
module attributes {stable_mosaic.version = 11 : i64} {
  func.func @generator_kernel(%arg0: i32, %arg1: memref<8x16xf32, #tpu.memory_space<vmem>>, %arg2: memref<16x128xf32, #tpu.memory_space<vmem>>, %arg3: memref<1x128xf32, #tpu.memory_space<vmem>>, %arg4: memref<128x256xf32, #tpu.memory_space<vmem>>, %arg5: memref<1x256xf32, #tpu.memory_space<vmem>>, %arg6: memref<256x512xf32, #tpu.memory_space<vmem>>, %arg7: memref<1x512xf32, #tpu.memory_space<vmem>>, %arg8: memref<8x512xf32, #tpu.memory_space<vmem>>) attributes {dimension_semantics = [#tpu.dimension_semantics<parallel>], iteration_bounds = array<i64: 1>, scalar_prefetch = 0 : i64, scratch_operands = 0 : i64, tpu.core_type = #tpu.core_type<tc>, window_params = [{transform_indices = @transform_0, window_bounds = array<i64: 8, 16>}, {pipeline_mode = #tpu.pipeline_mode<synchronous>, transform_indices = @transform_1, window_bounds = array<i64: 16, 128>}, {pipeline_mode = #tpu.pipeline_mode<synchronous>, transform_indices = @transform_2, window_bounds = array<i64: 1, 128>}, {pipeline_mode = #tpu.pipeline_mode<synchronous>, transform_indices = @transform_3, window_bounds = array<i64: 128, 256>}, {pipeline_mode = #tpu.pipeline_mode<synchronous>, transform_indices = @transform_4, window_bounds = array<i64: 1, 256>}, {pipeline_mode = #tpu.pipeline_mode<synchronous>, transform_indices = @transform_5, window_bounds = array<i64: 256, 512>}, {pipeline_mode = #tpu.pipeline_mode<synchronous>, transform_indices = @transform_6, window_bounds = array<i64: 1, 512>}, {transform_indices = @transform_7, window_bounds = array<i64: 8, 512>}]} {
    %c0 = arith.constant 0 : index
    %c0_0 = arith.constant 0 : index
    %0 = vector.load %arg1[%c0, %c0_0] : memref<8x16xf32, #tpu.memory_space<vmem>>, vector<8x16xf32>
    %c0_1 = arith.constant 0 : index
    %c0_2 = arith.constant 0 : index
    %1 = vector.load %arg2[%c0_1, %c0_2] : memref<16x128xf32, #tpu.memory_space<vmem>>, vector<16x128xf32>
    %cst = arith.constant dense<0.000000e+00> : vector<8x128xf32>
    %2 = tpu.matmul %0, %1, %cst {dimension_numbers = #tpu.dot_dimension_numbers<[1], [0], [0], [1], [0, 0, 1, 1], [], []>} : vector<8x16xf32>, vector<16x128xf32>, vector<8x128xf32> -> vector<8x128xf32>
    %c0_3 = arith.constant 0 : index
    %c0_4 = arith.constant 0 : index
    %3 = vector.load %arg3[%c0_3, %c0_4] : memref<1x128xf32, #tpu.memory_space<vmem>>, vector<1x128xf32>
    %4 = vector.broadcast %3 : vector<1x128xf32> to vector<8x128xf32>
    %5 = arith.addf %2, %4 : vector<8x128xf32>
    %cst_5 = arith.constant 0.000000e+00 : f32
    %6 = vector.broadcast %cst_5 : f32 to vector<8x128xf32>
    %7 = arith.cmpf oge, %5, %6 : vector<8x128xf32>
    %cst_6 = arith.constant 0.00999999977 : f32
    %8 = vector.broadcast %cst_6 : f32 to vector<8x128xf32>
    %9 = arith.mulf %8, %5 : vector<8x128xf32>
    %10 = arith.select %7, %5, %9 : vector<8x128xi1>, vector<8x128xf32>
    %c0_7 = arith.constant 0 : index
    %c0_8 = arith.constant 0 : index
    %11 = vector.load %arg4[%c0_7, %c0_8] : memref<128x256xf32, #tpu.memory_space<vmem>>, vector<128x256xf32>
    %cst_9 = arith.constant dense<0.000000e+00> : vector<8x256xf32>
    %12 = tpu.matmul %10, %11, %cst_9 {dimension_numbers = #tpu.dot_dimension_numbers<[1], [0], [0], [1], [0, 0, 1, 1], [], []>} : vector<8x128xf32>, vector<128x256xf32>, vector<8x256xf32> -> vector<8x256xf32>
    %c0_10 = arith.constant 0 : index
    %c0_11 = arith.constant 0 : index
    %13 = vector.load %arg5[%c0_10, %c0_11] : memref<1x256xf32, #tpu.memory_space<vmem>>, vector<1x256xf32>
    %14 = vector.broadcast %13 : vector<1x256xf32> to vector<8x256xf32>
    %15 = arith.addf %12, %14 : vector<8x256xf32>
    %cst_12 = arith.constant 0.000000e+00 : f32
    %16 = vector.broadcast %cst_12 : f32 to vector<8x256xf32>
    %17 = arith.cmpf oge, %15, %16 : vector<8x256xf32>
    %cst_13 = arith.constant 0.00999999977 : f32
    %18 = vector.broadcast %cst_13 : f32 to vector<8x256xf32>
    %19 = arith.mulf %18, %15 : vector<8x256xf32>
    %20 = arith.select %17, %15, %19 : vector<8x256xi1>, vector<8x256xf32>
    %c0_14 = arith.constant 0 : index
    %c0_15 = arith.constant 0 : index
    %21 = vector.load %arg6[%c0_14, %c0_15] : memref<256x512xf32, #tpu.memory_space<vmem>>, vector<256x512xf32>
    %cst_16 = arith.constant dense<0.000000e+00> : vector<8x512xf32>
    %22 = tpu.matmul %20, %21, %cst_16 {dimension_numbers = #tpu.dot_dimension_numbers<[1], [0], [0], [1], [0, 0, 1, 1], [], []>} : vector<8x256xf32>, vector<256x512xf32>, vector<8x512xf32> -> vector<8x512xf32>
    %c0_17 = arith.constant 0 : index
    %c0_18 = arith.constant 0 : index
    %23 = vector.load %arg7[%c0_17, %c0_18] : memref<1x512xf32, #tpu.memory_space<vmem>>, vector<1x512xf32>
    %24 = vector.broadcast %23 : vector<1x512xf32> to vector<8x512xf32>
    %25 = arith.addf %22, %24 : vector<8x512xf32>
    %c0_19 = arith.constant 0 : index
    %c0_20 = arith.constant 0 : index
    %26 = vector.load %arg8[%c0_19, %c0_20] : memref<8x512xf32, #tpu.memory_space<vmem>>, vector<8x512xf32>
    tpu.vector_store %arg8[%c0_19, %c0_20], %25 {strides = array<i32>} : memref<8x512xf32, #tpu.memory_space<vmem>>, vector<8x512xf32>,
    return
  }
  func.func @transform_0(%arg0: i32) -> (i32, i32) {
    %c0_i32 = arith.constant 0 : i32
    %c0_i32_0 = arith.constant 0 : i32
    return %arg0, %c0_i32 : i32, i32
  }
  func.func @transform_1(%arg0: i32) -> (i32, i32) {
    %c0_i32 = arith.constant 0 : i32
    %c0_i32_0 = arith.constant 0 : i32
    %c0_i32_1 = arith.constant 0 : i32
    return %c0_i32, %c0_i32_0 : i32, i32
  }
  func.func @transform_2(%arg0: i32) -> (i32, i32) {
    %c0_i32 = arith.constant 0 : i32
    %c0_i32_0 = arith.constant 0 : i32
    %c0_i32_1 = arith.constant 0 : i32
    return %c0_i32, %c0_i32_0 : i32, i32
  }
  func.func @transform_3(%arg0: i32) -> (i32, i32) {
    %c0_i32 = arith.constant 0 : i32
    %c0_i32_0 = arith.constant 0 : i32
    %c0_i32_1 = arith.constant 0 : i32
    return %c0_i32, %c0_i32_0 : i32, i32
  }
  func.func @transform_4(%arg0: i32) -> (i32, i32) {
    %c0_i32 = arith.constant 0 : i32
    %c0_i32_0 = arith.constant 0 : i32
    %c0_i32_1 = arith.constant 0 : i32
    return %c0_i32, %c0_i32_0 : i32, i32
  }
  func.func @transform_5(%arg0: i32) -> (i32, i32) {
    %c0_i32 = arith.constant 0 : i32
    %c0_i32_0 = arith.constant 0 : i32
    %c0_i32_1 = arith.constant 0 : i32
    return %c0_i32, %c0_i32_0 : i32, i32
  }
  func.func @transform_6(%arg0: i32) -> (i32, i32) {
    %c0_i32 = arith.constant 0 : i32
    %c0_i32_0 = arith.constant 0 : i32
    %c0_i32_1 = arith.constant 0 : i32
    return %c0_i32, %c0_i32_0 : i32, i32
  }
  func.func @transform_7(%arg0: i32) -> (i32, i32) {
    %c0_i32 = arith.constant 0 : i32
    %c0_i32_0 = arith.constant 0 : i32
    return %arg0, %c0_i32 : i32, i32
  }
}

</mosaic_0001>

<bundles_post_ra>
// kernel: tpu_custom_call.1
= control target key start
LH: loop header
LB: loop body
LE: loop exit
PB: predicated region body
PF: predicated region fallthrough
CT: control target
= control target key end

     0   :  { %12 = vsyncpa [#allocation3], 0  ;;  %s782_s0 = inlined_call_operand.hbm [shape: f32[8,16], index: 0, kind: input, shape index: {}]   ;;  %s783_s1 = inlined_call_operand.hbm [shape: f32[16,128], index: 1, kind: input, shape index: {}]   ;;  %s784_s2 = inlined_call_operand.vmem [shape: f32[1,128], index: 2, kind: input, shape index: {}]   ;;  %s785_s3 = inlined_call_operand.hbm [shape: f32[128,256], index: 3, kind: input, shape index: {}]   ;;  %s786_s4 = inlined_call_operand.hbm [shape: f32[1,256], index: 4, kind: input, shape index: {}]   ;;  %s787_s5 = inlined_call_operand.hbm [shape: f32[256,512], index: 5, kind: input, shape index: {}]   ;;  %s788_s6 = inlined_call_operand.vmem [shape: f32[1,512], index: 6, kind: input, shape index: {}]   ;;  %s789_s7 = inlined_call_operand.hbm [shape: f32[8,512], index: 7, kind: output, shape index: {}]  }
   0x1   :  { %13 = vsyncpa [#allocation6], 0 }
   0x2   :  { %14 = vsyncpa [#allocation9], 0  ;;  %s31_s26 = sshll.u32 %s783_s1, 4  ;;  %s32_s26 = int_to_ptr.hbm [resolvable:$true] %s31_s26 }
   0x3   :  { %15 = vsyncpa [#allocation4], 0  ;;  %s706_s27 = smov [#allocation5]   ;;  %s60_s8 = sshll.u32 %s786_s4, 4  ;;  %s61_s8 = int_to_ptr.hbm [resolvable:$true] %s60_s8 }
   0x4   :  { %s33_s28 = sshll.u32 %s706_s27, 4  ;;  %s707_s9 = smov 128   ;;  %s34_s28 = int_to_ptr.vmem [resolvable:$true] %s33_s28 }
   0x5   :  { %s708_s10 = smov 8   ;;  %s709_s11 = smov [#allocation8]  }
   0x6   :  { %39 = dma.hbm_to_vmem [thread:$0]  %s32_s26, 256, %s34_s28, [#allocation6], %s707_s9, %s707_s9, %s708_s10  }
   0x7   :  { %s62_s12 = sshll.u32 %s709_s11, 4  ;;  %s21_s15 = sshll.u32 %s782_s0, 4  ;;  %s63_s12 = int_to_ptr.vmem [resolvable:$true] %s62_s12  ;;  %s22_s15 = int_to_ptr.hbm [resolvable:$true] %s21_s15 }
   0x8   :  { %65 = dma.hbm_to_vmem [thread:$0]  %s61_s8, 32, %s63_s12, [#allocation9]  }
   0x9   :  { %s46_s17 = sshll.u32 %s785_s3, 4  ;;  %s710_s18 = smov [#allocation2]   ;;  %s47_s17 = int_to_ptr.hbm [resolvable:$true] %s46_s17 }
   0xa   :  { %s23_s19 = sshll.u32 %s710_s18, 4  ;;  %s711_s4 = smov [#allocation7]   ;;  %s24_s19 = int_to_ptr.vmem [resolvable:$true] %s23_s19 }
   0xb   :  { %26 = dma.hbm_to_vmem [thread:$0]  %s22_s15, 128, %s24_s19, [#allocation3]  }
   0xc   :  { %s48_s20 = sshll.u32 %s711_s4, 4  ;;  %s712_s21 = smov 256   ;;  %s49_s20 = int_to_ptr.vmem [resolvable:$true] %s48_s20 }
   0xd   :  { %s713_s22 = smov 16   ;;  %s70_s24 = sshll.u32 %s787_s5, 4  ;;  %s71_s24 = int_to_ptr.hbm [resolvable:$true] %s70_s24 }
   0xe   :  { %54 = dma.hbm_to_vmem [thread:$0]  %s47_s17, 4096, %s49_s20, [#allocation6], %s712_s21, %s712_s21, %s713_s22  }
   0xf   :  { %s714_s25 = smov [#allocation10]   ;;  %s715_s3 = smov 512  }
  0x10   :  { %s72_s26 = sshll.u32 %s714_s25, 4  ;;  %s716_s27 = smov 32   ;;  %s73_s26 = int_to_ptr.vmem [resolvable:$true] %s72_s26 }
  0x11   :  { %78 = dma.hbm_to_vmem [thread:$0]  %s71_s24, 16384, %s73_s26, [#allocation9], %s715_s3, %s715_s3, %s716_s27  }
  0x12   :  { %698 = dma.done.wait [#allocation3], 128  }
  0x13   :  { %699 = vsyncadd [#allocation3], 4294967168 }
  0x14   :  { %700 = dma.done.wait [#allocation6], 4352  }
  0x15   :  { %701 = vsyncadd [#allocation6], 4294962944 }
  0x16   :  { %702 = dma.done.wait [#allocation9], 16416  }
  0x17   :  { %703 = vsyncadd [#allocation9], 4294950880  ;;  %v103_v0 = vld [vmem:[#allocation5 + $0x8] sm:$0xff]  ;;  %v102_v1 = vld [vmem:[#allocation5] sm:$0xff]  ;;  %vm108_vm0 = vcmask 130048   ;;  %s528_s10 = sshll.u32 %s789_s7, 4  ;;  %s529_s10 = int_to_ptr.hbm [resolvable:$true] %s528_s10 }
  0x18   :  { %v101_v2 = vld [vmem:[#allocation2] sm:$0xff]  ;;  %126 = vmatpush.msra.mxu0 %v103_v0  ;;  %v165_v3 = vld [vmem:[#allocation7 + $0xf0] sm:$0xff]  ;;  %v166_v4 = vld [vmem:[#allocation7 + $0xf8] sm:$0xff] }
  0x19   :  { %v163_v5 = vld [vmem:[#allocation7 + $0xe0] sm:$0xff]  ;;  %173 = vmatpush.msra.mxu1 %v165_v3  ;;  %193 = vmatpush.msra.mxu2 %v166_v4  ;;  %v164_v6 = vld [vmem:[#allocation7 + $0xe8] sm:$0xff]  ;;  %v161_v7 = vld [vmem:[#allocation7 + $0xd0] sm:$0xff] }
  0x1a   :  { %127 = vmatpush.msra.mxu0 %v102_v1  ;;  %v162_v8 = vld [vmem:[#allocation7 + $0xd8] sm:$0xff]  ;;  %v159_v9 = vld [vmem:[#allocation7 + $0xc0] sm:$0xff]  ;;  %v160_v10 = vld [vmem:[#allocation7 + $0xc8] sm:$0xff] }
  0x1b   :  { %540 = vmatmul.msk.f32.vlgmr.msra.gmra.mxu0 %vm108_vm0, %v101_v2  ;;  %174 = vmatpush.msra.mxu1 %v163_v5  ;;  %v157_v11 = vld [vmem:[#allocation7 + $0xb0] sm:$0xff]  ;;  %v158_v12 = vld [vmem:[#allocation7 + $0xb8] sm:$0xff]  ;;  %v155_v13 = vld [vmem:[#allocation7 + $0xa0] sm:$0xff] }
  0x1c   :  { %194 = vmatpush.msra.mxu2 %v164_v6  ;;  %v156_v14 = vld [vmem:[#allocation7 + $0xa8] sm:$0xff]  ;;  %v153_v15 = vld [vmem:[#allocation7 + $0x90] sm:$0xff]  ;;  %v154_v16 = vld [vmem:[#allocation7 + $0x98] sm:$0xff] }
  0x1d   :  { %175 = vmatpush.msra.mxu1 %v161_v7  ;;  %v151_v17 = vld [vmem:[#allocation7 + $0x80] sm:$0xff]  ;;  %v152_v18 = vld [vmem:[#allocation7 + $0x88] sm:$0xff]  ;;  %v149_v19 = vld [vmem:[#allocation7 + $0x70] sm:$0xff] }
  0x1e   :  { %195 = vmatpush.msra.mxu2 %v162_v8  ;;  %v150_v20 = vld [vmem:[#allocation7 + $0x78] sm:$0xff]  ;;  %v147_v21 = vld [vmem:[#allocation7 + $0x60] sm:$0xff]  ;;  %v148_v22 = vld [vmem:[#allocation7 + $0x68] sm:$0xff] }
  0x1f   :  { %176 = vmatpush.msra.mxu1 %v159_v9  ;;  %v145_v23 = vld [vmem:[#allocation7 + $0x50] sm:$0xff]  ;;  %v146_v24 = vld [vmem:[#allocation7 + $0x58] sm:$0xff]  ;;  %v143_v25 = vld [vmem:[#allocation7 + $0x40] sm:$0xff] }
  0x20   :  { %196 = vmatpush.msra.mxu2 %v160_v10  ;;  %v144_v26 = vld [vmem:[#allocation7 + $0x48] sm:$0xff]  ;;  %v141_v27 = vld [vmem:[#allocation7 + $0x30] sm:$0xff]  ;;  %v142_v28 = vld [vmem:[#allocation7 + $0x38] sm:$0xff] }
  0x21   :  { %177 = vmatpush.msra.mxu1 %v157_v11  ;;  %v139_v29 = vld [vmem:[#allocation7 + $0x20] sm:$0xff]  ;;  %v140_v30 = vld [vmem:[#allocation7 + $0x28] sm:$0xff]  ;;  %v137_v31 = vld [vmem:[#allocation7 + $0x10] sm:$0xff] }
  0x22   :  { %197 = vmatpush.msra.mxu2 %v158_v12  ;;  %v138_v32 = vld [vmem:[#allocation7 + $0x18] sm:$0xff]  ;;  %v135_v33 = vld [vmem:[#allocation7] sm:$0xff]  ;;  %v136_v34 = vld [vmem:[#allocation7 + $0x8] sm:$0xff] }
  0x23   :  { %178 = vmatpush.msra.mxu1 %v155_v13  ;;  %v279_v35 = vld [vmem:[#allocation10 + $0x1e0] sm:$0xff]  ;;  %v280_v36 = vld [vmem:[#allocation10 + $0x1e8] sm:$0xff] }
  0x24   :  { %198 = vmatpush.msra.mxu2 %v156_v14  ;;  %v275_v37 = vld [vmem:[#allocation10 + $0x1c0] sm:$0xff]  ;;  %357 = vmatpush.msra.mxu3 %v279_v35  ;;  %v276_v38 = vld [vmem:[#allocation10 + $0x1c8] sm:$0xff]  ;;  %v281_v35 = vld [vmem:[#allocation10 + $0x1f0] sm:$0xff] }
  0x25   :  { %179 = vmatpush.msra.mxu1 %v153_v15  ;;  %v271_v39 = vld [vmem:[#allocation10 + $0x1a0] sm:$0xff]  ;;  %v272_v40 = vld [vmem:[#allocation10 + $0x1a8] sm:$0xff] }
  0x26   :  { %199 = vmatpush.msra.mxu2 %v154_v16  ;;  %v343_v41 = vld [vmem:[#allocation10 + $0x3e0] sm:$0xff]  ;;  %358 = vmatpush.msra.mxu3 %v275_v37  ;;  %v344_v42 = vld [vmem:[#allocation10 + $0x3e8] sm:$0xff] }
  0x27   :  { %180 = vmatpush.msra.mxu1 %v151_v17  ;;  %v339_v43 = vld [vmem:[#allocation10 + $0x3c0] sm:$0xff]  ;;  %377 = vmatpush.msrb.mxu0 %v343_v41  ;;  %v268_v45 = vld [vmem:[#allocation10 + $0x188] sm:$0xff]  ;;  %v278_v41 = vld [vmem:[#allocation10 + $0x1d8] sm:$0xff] }
  0x28   :  { %200 = vmatpush.msra.mxu2 %v152_v18  ;;  %v267_v44 = vld [vmem:[#allocation10 + $0x180] sm:$0xff]  ;;  %v340_v46 = vld [vmem:[#allocation10 + $0x3c8] sm:$0xff]  ;;  %359 = vmatpush.msra.mxu3 %v271_v39 }
  0x29   :  { %181 = vmatpush.msra.mxu1 %v149_v19  ;;  %v335_v47 = vld [vmem:[#allocation10 + $0x3a0] sm:$0xff]  ;;  %v336_v48 = vld [vmem:[#allocation10 + $0x3a8] sm:$0xff]  ;;  %378 = vmatpush.msrb.mxu0 %v339_v43 }
  0x2a   :  { %201 = vmatpush.msra.mxu2 %v150_v20  ;;  %v263_v49 = vld [vmem:[#allocation10 + $0x160] sm:$0xff]  ;;  %v264_v50 = vld [vmem:[#allocation10 + $0x168] sm:$0xff]  ;;  %360 = vmatpush.msra.mxu3 %v267_v44  ;;  %v273_v44 = vld [vmem:[#allocation10 + $0x1b0] sm:$0xff] }
  0x2b   :  { %182 = vmatpush.msra.mxu1 %v147_v21  ;;  %v331_v51 = vld [vmem:[#allocation10 + $0x380] sm:$0xff]  ;;  %v332_v52 = vld [vmem:[#allocation10 + $0x388] sm:$0xff]  ;;  %379 = vmatpush.msrb.mxu0 %v335_v47  ;;  %v346_v47 = vld [vmem:[#allocation10 + $0x3f8] sm:$0xff] }
  0x2c   :  { %202 = vmatpush.msra.mxu2 %v148_v22  ;;  %v259_v53 = vld [vmem:[#allocation10 + $0x140] sm:$0xff]  ;;  %v260_v54 = vld [vmem:[#allocation10 + $0x148] sm:$0xff]  ;;  %361 = vmatpush.msra.mxu3 %v263_v49  ;;  %v270_v49 = vld [vmem:[#allocation10 + $0x198] sm:$0xff] }
  0x2d   :  { %183 = vmatpush.msra.mxu1 %v145_v23  ;;  %v327_v55 = vld [vmem:[#allocation10 + $0x360] sm:$0xff]  ;;  %v328_v56 = vld [vmem:[#allocation10 + $0x368] sm:$0xff]  ;;  %380 = vmatpush.msrb.mxu0 %v331_v51  ;;  %v342_v51 = vld [vmem:[#allocation10 + $0x3d8] sm:$0xff] }
  0x2e   :  { %203 = vmatpush.msra.mxu2 %v146_v24  ;;  %v255_v57 = vld [vmem:[#allocation10 + $0x120] sm:$0xff]  ;;  %v256_v58 = vld [vmem:[#allocation10 + $0x128] sm:$0xff]  ;;  %362 = vmatpush.msra.mxu3 %v259_v53  ;;  %v266_v53 = vld [vmem:[#allocation10 + $0x178] sm:$0xff] }
  0x2f   :  { %184 = vmatpush.msra.mxu1 %v143_v25  ;;  %v323_v59 = vld [vmem:[#allocation10 + $0x340] sm:$0xff]  ;;  %v324_v60 = vld [vmem:[#allocation10 + $0x348] sm:$0xff]  ;;  %381 = vmatpush.msrb.mxu0 %v327_v55  ;;  %v338_v55 = vld [vmem:[#allocation10 + $0x3b8] sm:$0xff] }
  0x30   :  { %204 = vmatpush.msra.mxu2 %v144_v26  ;;  %v251_v61 = vld [vmem:[#allocation10 + $0x100] sm:$0xff]  ;;  %v252_v62 = vld [vmem:[#allocation10 + $0x108] sm:$0xff]  ;;  %363 = vmatpush.msra.mxu3 %v255_v57  ;;  %v262_v57 = vld [vmem:[#allocation10 + $0x158] sm:$0xff] }
  0x31   :  { %185 = vmatpush.msra.mxu1 %v141_v27  ;;  %v319_v63 = vld [vmem:[#allocation10 + $0x320] sm:$0xff]  ;;  %v320_v0 = vld [vmem:[#allocation10 + $0x328] sm:$0xff]  ;;  %382 = vmatpush.msrb.mxu0 %v323_v59  ;;  %v334_v59 = vld [vmem:[#allocation10 + $0x398] sm:$0xff] }
  0x32   :  { %205 = vmatpush.msra.mxu2 %v142_v28  ;;  %v247_v1 = vld [vmem:[#allocation10 + $0xe0] sm:$0xff]  ;;  %v248_v2 = vld [vmem:[#allocation10 + $0xe8] sm:$0xff]  ;;  %364 = vmatpush.msra.mxu3 %v251_v61  ;;  %v258_v61 = vld [vmem:[#allocation10 + $0x138] sm:$0xff] }
  0x33   :  { %186 = vmatpush.msra.mxu1 %v139_v29  ;;  %v315_v3 = vld [vmem:[#allocation10 + $0x300] sm:$0xff]  ;;  %v316_v4 = vld [vmem:[#allocation10 + $0x308] sm:$0xff]  ;;  %383 = vmatpush.msrb.mxu0 %v319_v63  ;;  %v330_v63 = vld [vmem:[#allocation10 + $0x378] sm:$0xff] }
  0x34   :  { %206 = vmatpush.msra.mxu2 %v140_v30  ;;  %v243_v5 = vld [vmem:[#allocation10 + $0xc0] sm:$0xff]  ;;  %v244_v6 = vld [vmem:[#allocation10 + $0xc8] sm:$0xff]  ;;  %365 = vmatpush.msra.mxu3 %v247_v1  ;;  %v254_v1 = vld [vmem:[#allocation10 + $0x118] sm:$0xff] }
  0x35   :  { %187 = vmatpush.msra.mxu1 %v137_v31  ;;  %v311_v7 = vld [vmem:[#allocation10 + $0x2e0] sm:$0xff]  ;;  %v312_v8 = vld [vmem:[#allocation10 + $0x2e8] sm:$0xff]  ;;  %384 = vmatpush.msrb.mxu0 %v315_v3  ;;  %v326_v3 = vld [vmem:[#allocation10 + $0x358] sm:$0xff] }
  0x36   :  { %207 = vmatpush.msra.mxu2 %v138_v32  ;;  %v239_v9 = vld [vmem:[#allocation10 + $0xa0] sm:$0xff]  ;;  %v240_v10 = vld [vmem:[#allocation10 + $0xa8] sm:$0xff]  ;;  %366 = vmatpush.msra.mxu3 %v243_v5  ;;  %v250_v5 = vld [vmem:[#allocation10 + $0xf8] sm:$0xff] }
  0x37   :  { %188 = vmatpush.msra.mxu1 %v135_v33  ;;  %v307_v11 = vld [vmem:[#allocation10 + $0x2c0] sm:$0xff]  ;;  %v308_v12 = vld [vmem:[#allocation10 + $0x2c8] sm:$0xff]  ;;  %385 = vmatpush.msrb.mxu0 %v311_v7  ;;  %v321_v7 = vld [vmem:[#allocation10 + $0x330] sm:$0xff] }
  0x38   :  { %208 = vmatpush.msra.mxu2 %v136_v34  ;;  %v235_v13 = vld [vmem:[#allocation10 + $0x80] sm:$0xff]  ;;  %v236_v14 = vld [vmem:[#allocation10 + $0x88] sm:$0xff]  ;;  %367 = vmatpush.msra.mxu3 %v239_v9  ;;  %v322_v9 = vld [vmem:[#allocation10 + $0x338] sm:$0xff] }
  0x39   :  { %397 = vmatpush.msrb.mxu1 %v280_v36  ;;  %v303_v15 = vld [vmem:[#allocation10 + $0x2a0] sm:$0xff]  ;;  %v304_v16 = vld [vmem:[#allocation10 + $0x2a8] sm:$0xff]  ;;  %386 = vmatpush.msrb.mxu0 %v307_v11  ;;  %v282_v36 = vld [vmem:[#allocation10 + $0x1f8] sm:$0xff] }
  0x3a   :  { %417 = vmatpush.msrb.mxu2 %v344_v42  ;;  %v231_v17 = vld [vmem:[#allocation10 + $0x60] sm:$0xff]  ;;  %v232_v18 = vld [vmem:[#allocation10 + $0x68] sm:$0xff]  ;;  %368 = vmatpush.msra.mxu3 %v235_v13  ;;  %v317_v11 = vld [vmem:[#allocation10 + $0x310] sm:$0xff] }
  0x3b   :  { %398 = vmatpush.msrb.mxu1 %v276_v38  ;;  %v553_v19 = vld [vmem:[%s784_s2] ss:$0 sm:$0xff]  ;;  %v300_v21 = vld [vmem:[#allocation10 + $0x288] sm:$0xff]  ;;  %387 = vmatpush.msrb.mxu0 %v303_v15  ;;  %v318_v13 = vld [vmem:[#allocation10 + $0x318] sm:$0xff] }
  0x3c   :  { %418 = vmatpush.msrb.mxu2 %v340_v46  ;;  %v299_v20 = vld [vmem:[#allocation10 + $0x280] sm:$0xff]  ;;  %v228_v23 = vld [vmem:[#allocation10 + $0x48] sm:$0xff]  ;;  %369 = vmatpush.msra.mxu3 %v231_v17  ;;  %v345_v46 = vld [vmem:[#allocation10 + $0x3f0] sm:$0xff] }
  0x3d   :  { %399 = vmatpush.msrb.mxu1 %v272_v40  ;;  %v227_v22 = vld [vmem:[#allocation10 + $0x40] sm:$0xff]  ;;  %v296_v25 = vld [vmem:[#allocation10 + $0x268] sm:$0xff]  ;;  %388 = vmatpush.msrb.mxu0 %v299_v20  ;;  %v277_v40 = vld [vmem:[#allocation10 + $0x1d0] sm:$0xff] }
  0x3e   :  { %419 = vmatpush.msrb.mxu2 %v336_v48  ;;  %v295_v24 = vld [vmem:[#allocation10 + $0x260] sm:$0xff]  ;;  %v224_v28 = vld [vmem:[#allocation10 + $0x28] sm:$0xff]  ;;  %370 = vmatpush.msra.mxu3 %v227_v22  ;;  %v269_v48 = vld [vmem:[#allocation10 + $0x190] sm:$0xff] }
  0x3f   :  { %400 = vmatpush.msrb.mxu1 %v268_v45  ;;  %v223_v27 = vld [vmem:[#allocation10 + $0x20] sm:$0xff]  ;;  %v292_v31 = vld [vmem:[#allocation10 + $0x248] sm:$0xff]  ;;  %389 = vmatpush.msrb.mxu0 %v295_v24  ;;  %v274_v45 = vld [vmem:[#allocation10 + $0x1b8] sm:$0xff] }
  0x40   :  { %420 = vmatpush.msrb.mxu2 %v332_v52  ;;  %v291_v30 = vld [vmem:[#allocation10 + $0x240] sm:$0xff]  ;;  %v220_v33 = vld [vmem:[#allocation10 + $0x8] sm:$0xff]  ;;  %371 = vmatpush.msra.mxu3 %v223_v27  ;;  %v265_v52 = vld [vmem:[#allocation10 + $0x170] sm:$0xff] }
  0x41   :  { %401 = vmatpush.msrb.mxu1 %v264_v50  ;;  %v219_v32 = vld [vmem:[#allocation10] sm:$0xff]  ;;  %390 = vmatpush.msrb.mxu0 %v291_v30  ;;  %v288_v39 = vld [vmem:[#allocation10 + $0x228] sm:$0xff]  ;;  %v341_v50 = vld [vmem:[#allocation10 + $0x3d0] sm:$0xff] }
  0x42   :  { %421 = vmatpush.msrb.mxu2 %v328_v56  ;;  %372 = vmatpush.msra.mxu3 %v219_v32  ;;  %v287_v38 = vld [vmem:[#allocation10 + $0x220] sm:$0xff]  ;;  %v284_v43 = vld [vmem:[#allocation10 + $0x208] sm:$0xff]  ;;  %v261_v56 = vld [vmem:[#allocation10 + $0x150] sm:$0xff] }
  0x43   :  { %402 = vmatpush.msrb.mxu1 %v260_v54  ;;  %v283_v42 = vld [vmem:[#allocation10 + $0x200] sm:$0xff]  ;;  %391 = vmatpush.msrb.mxu0 %v287_v38  ;;  %v337_v54 = vld [vmem:[#allocation10 + $0x3b0] sm:$0xff]  ;;  %v314_v17 = vld [vmem:[#allocation10 + $0x2f8] sm:$0xff] }
  0x44   :  { %422 = vmatpush.msrb.mxu2 %v324_v60  ;;  %437 = vmatpush.msrb.mxu3 %v281_v35  ;;  %v257_v60 = vld [vmem:[#allocation10 + $0x130] sm:$0xff]  ;;  %v234_v20 = vld [vmem:[#allocation10 + $0x78] sm:$0xff] }
  0x45   :  { %403 = vmatpush.msrb.mxu1 %v256_v58  ;;  %392 = vmatpush.msrb.mxu0 %v283_v42  ;;  %v333_v58 = vld [vmem:[#allocation10 + $0x390] sm:$0xff]  ;;  %v230_v24 = vld [vmem:[#allocation10 + $0x58] sm:$0xff] }
  0x46   :  { %423 = vmatpush.msrb.mxu2 %v320_v0  ;;  %438 = vmatpush.msrb.mxu3 %v277_v40  ;;  %v253_v0 = vld [vmem:[#allocation10 + $0x110] sm:$0xff]  ;;  %v222_v32 = vld [vmem:[#allocation10 + $0x18] sm:$0xff] }
  0x47   :  { %404 = vmatpush.msrb.mxu1 %v252_v62  ;;  %457 = vmatpush.msra.mxu0 %v345_v46  ;;  %v329_v62 = vld [vmem:[#allocation10 + $0x370] sm:$0xff]  ;;  %v294_v35 = vld [vmem:[#allocation10 + $0x258] sm:$0xff] }
  0x48   :  { %424 = vmatpush.msrb.mxu2 %v316_v4  ;;  %439 = vmatpush.msrb.mxu3 %v273_v44  ;;  %v249_v4 = vld [vmem:[#allocation10 + $0xf0] sm:$0xff]  ;;  %v167_v40 = vld [vmem:[#allocation8] sm:$0x3] }
  0x49   :  { %405 = vmatpush.msrb.mxu1 %v248_v2  ;;  %458 = vmatpush.msra.mxu0 %v341_v50  ;;  %v325_v2 = vld [vmem:[#allocation10 + $0x350] sm:$0xff] }
  0x4a   :  { %425 = vmatpush.msrb.mxu2 %v312_v8  ;;  %440 = vmatpush.msrb.mxu3 %v269_v48  ;;  %v246_v8 = vld [vmem:[#allocation10 + $0xd8] sm:$0xff]  ;;  %v313_v15 = vld [vmem:[#allocation10 + $0x2f0] sm:$0xff] }
  0x4b   :  { %406 = vmatpush.msrb.mxu1 %v244_v6  ;;  %459 = vmatpush.msra.mxu0 %v337_v54  ;;  %v245_v6 = vld [vmem:[#allocation10 + $0xd0] sm:$0xff] }
  0x4c   :  { %426 = vmatpush.msrb.mxu2 %v308_v12  ;;  %441 = vmatpush.msrb.mxu3 %v265_v52  ;;  %v242_v12 = vld [vmem:[#allocation10 + $0xb8] sm:$0xff]  ;;  %v229_v22 = vld [vmem:[#allocation10 + $0x50] sm:$0xff] }
  0x4d   :  { %407 = vmatpush.msrb.mxu1 %v240_v10  ;;  %460 = vmatpush.msra.mxu0 %v333_v58  ;;  %v241_v10 = vld [vmem:[#allocation10 + $0xb0] sm:$0xff] }
  0x4e   :  { %427 = vmatpush.msrb.mxu2 %v304_v16  ;;  %442 = vmatpush.msrb.mxu3 %v261_v56  ;;  %v238_v16 = vld [vmem:[#allocation10 + $0x98] sm:$0xff]  ;;  %v301_v27 = vld [vmem:[#allocation10 + $0x290] sm:$0xff] }
  0x4f   :  { %408 = vmatpush.msrb.mxu1 %v236_v14  ;;  %461 = vmatpush.msra.mxu0 %v329_v62  ;;  %v237_v14 = vld [vmem:[#allocation10 + $0x90] sm:$0xff] }
  0x50   :  { %428 = vmatpush.msrb.mxu2 %v300_v21  ;;  %443 = vmatpush.msrb.mxu3 %v257_v60  ;;  %v310_v21 = vld [vmem:[#allocation10 + $0x2d8] sm:$0xff]  ;;  %v221_v30 = vld [vmem:[#allocation10 + $0x10] sm:$0xff] }
  0x51   :  { %409 = vmatpush.msrb.mxu1 %v232_v18  ;;  %462 = vmatpush.msra.mxu0 %v325_v2  ;;  %v233_v18 = vld [vmem:[#allocation10 + $0x70] sm:$0xff] }
  0x52   :  { %429 = vmatpush.msrb.mxu2 %v296_v25  ;;  %444 = vmatpush.msrb.mxu3 %v253_v0  ;;  %v306_v25 = vld [vmem:[#allocation10 + $0x2b8] sm:$0xff]  ;;  %v285_v38 = vld [vmem:[#allocation10 + $0x210] sm:$0xff] }
  0x53   :  { %410 = vmatpush.msrb.mxu1 %v228_v23  ;;  %463 = vmatpush.msra.mxu0 %v321_v7  ;;  %v305_v23 = vld [vmem:[#allocation10 + $0x2b0] sm:$0xff] }
  0x54   :  { %430 = vmatpush.msrb.mxu2 %v292_v31  ;;  %445 = vmatpush.msrb.mxu3 %v249_v4  ;;  %v297_v31 = vld [vmem:[#allocation10 + $0x270] sm:$0xff] }
  0x55   :  { %411 = vmatpush.msrb.mxu1 %v224_v28  ;;  %464 = vmatpush.msra.mxu0 %v317_v11  ;;  %v226_v28 = vld [vmem:[#allocation10 + $0x38] sm:$0xff] }
  0x56   :  { %431 = vmatpush.msrb.mxu2 %v288_v39  ;;  %446 = vmatpush.msrb.mxu3 %v245_v6  ;;  %v286_v39 = vld [vmem:[#allocation10 + $0x218] sm:$0xff] }
  0x57   :  { %412 = vmatpush.msrb.mxu1 %v220_v33  ;;  %465 = vmatpush.msra.mxu0 %v313_v15  ;;  %v298_v33 = vld [vmem:[#allocation10 + $0x278] sm:$0xff] }
  0x58   :  { %432 = vmatpush.msrb.mxu2 %v284_v43  ;;  %447 = vmatpush.msrb.mxu3 %v241_v10 }
  0x5a   :  { %448 = vmatpush.msrb.mxu3 %v237_v14 }
  0x5c   :  { %449 = vmatpush.msrb.mxu3 %v233_v18 }
  0x5e   :  { %450 = vmatpush.msrb.mxu3 %v229_v22 }
  0x98   :  { %v129_v26 = vpop.f32.mrf.mxu0 }
  0x99   :  { %v130_v29 = vadd.f32 %v553_v19, %v129_v26  ;;  %v309_v19 = vld [vmem:[#allocation10 + $0x2d0] sm:$0xff] }
  0x9a   :  { %466 = vmatpush.msra.mxu0 %v309_v19  ;;  %v225_v26 = vld [vmem:[#allocation10 + $0x30] sm:$0xff] }
  0x9b   :  { %vm132_vm1 = vcmp.ge.f32.partialorder %v130_v29, 0.0  ;;  %v133_v34 = vmul.f32 0.01, %v130_v29  ;;  %451 = vmatpush.msrb.mxu3 %v225_v26 }
  0x9c   :  { %467 = vmatpush.msra.mxu0 %v305_v23 }
  0x9d   :  { %v134_v37 = vsel %vm132_vm1, %v130_v29, %v133_v34  ;;  %v302_v29 = vld [vmem:[#allocation10 + $0x298] sm:$0xff]  ;;  %452 = vmatpush.msrb.mxu3 %v221_v30  ;;  %v293_v34 = vld [vmem:[#allocation10 + $0x250] sm:$0xff] }
  0x9e   :  { %189 = vmatmul.f32.vlgmr.msra.gmra.mxu1 %v134_v37  ;;  %209 = vmatmul.f32.vlgmr.msra.gmra.mxu2 %v134_v37  ;;  %v290_v37 = vld [vmem:[#allocation10 + $0x238] sm:$0xff] }
  0x9f   :  { %477 = vmatpush.msra.mxu1 %v282_v36  ;;  %497 = vmatpush.msra.mxu2 %v346_v47  ;;  %v289_v36 = vld [vmem:[#allocation10 + $0x230] sm:$0xff] }
  0xa0   :  { %468 = vmatpush.msra.mxu0 %v301_v27 }
  0xa1   :  { %478 = vmatpush.msra.mxu1 %v278_v41  ;;  %498 = vmatpush.msra.mxu2 %v342_v51  ;;  %v169_v41 = vperm.slane %v167_v40, 0  ;;  %v347_v51 = vld [vmem:[%s788_s6] sm:$0xf]  ;;  %s717_s6 = smov [#allocation11]  }
  0xa2   :  { %469 = vmatpush.msra.mxu0 %v297_v31  ;;  %v349_v52 = vperm.slane %v347_v51, 0  ;;  %v350_v56 = vperm.slane %v347_v51, 1  ;;  %v351_v60 = vperm.slane %v347_v51, 2  ;;  %v352_v0 = vperm.slane %v347_v51, 3  ;;  %s526_s30 = sshll.u32 %s717_s6, 4  ;;  %s527_s30 = int_to_ptr.vmem [resolvable:$true] %s526_s30 }
  0xa3   :  { %479 = vmatpush.msra.mxu1 %v274_v45  ;;  %499 = vmatpush.msra.mxu2 %v338_v55  ;;  %v170_v45 = vperm.slane %v167_v40, 1 }
  0xa4   :  { %470 = vmatpush.msra.mxu0 %v293_v34 }
  0xa5   :  { %480 = vmatpush.msra.mxu1 %v270_v49  ;;  %500 = vmatpush.msra.mxu2 %v334_v59 }
  0xa6   :  { %471 = vmatpush.msra.mxu0 %v289_v36 }
  0xa7   :  { %481 = vmatpush.msra.mxu1 %v266_v53  ;;  %501 = vmatpush.msra.mxu2 %v330_v63 }
  0xa8   :  { %472 = vmatpush.msra.mxu0 %v285_v38 }
  0xa9   :  { %482 = vmatpush.msra.mxu1 %v262_v57  ;;  %502 = vmatpush.msra.mxu2 %v326_v3 }
  0xab   :  { %483 = vmatpush.msra.mxu1 %v258_v61  ;;  %503 = vmatpush.msra.mxu2 %v322_v9 }
  0xad   :  { %484 = vmatpush.msra.mxu1 %v254_v1  ;;  %504 = vmatpush.msra.mxu2 %v318_v13 }
  0xaf   :  { %485 = vmatpush.msra.mxu1 %v250_v5  ;;  %505 = vmatpush.msra.mxu2 %v314_v17 }
  0xb1   :  { %486 = vmatpush.msra.mxu1 %v246_v8  ;;  %506 = vmatpush.msra.mxu2 %v310_v21 }
  0xb3   :  { %487 = vmatpush.msra.mxu1 %v242_v12  ;;  %507 = vmatpush.msra.mxu2 %v306_v25 }
  0xb5   :  { %488 = vmatpush.msra.mxu1 %v238_v16  ;;  %508 = vmatpush.msra.mxu2 %v302_v29 }
  0xb7   :  { %489 = vmatpush.msra.mxu1 %v234_v20  ;;  %509 = vmatpush.msra.mxu2 %v298_v33 }
  0xb9   :  { %490 = vmatpush.msra.mxu1 %v230_v24  ;;  %510 = vmatpush.msra.mxu2 %v294_v35 }
  0xbb   :  { %491 = vmatpush.msra.mxu1 %v226_v28  ;;  %511 = vmatpush.msra.mxu2 %v290_v37 }
  0xbd   :  { %492 = vmatpush.msra.mxu1 %v222_v32  ;;  %512 = vmatpush.msra.mxu2 %v286_v39 }
 0x11b   :  { %v190_v42 = vpop.f32.mrf.mxu1 }
 0x11c   :  { %v191_v43 = vadd.f32 %v190_v42, %v169_v41 }
 0x11e   :  { %vm213_vm2 = vcmp.ge.f32.partialorder %v191_v43, 0.0  ;;  %v215_v44 = vmul.f32 0.01, %v191_v43 }
 0x120   :  { %v217_v46 = vsel %vm213_vm2, %v191_v43, %v215_v44 }
 0x121   :  { %v210_v47 = vpop.f32.mrf.mxu2  ;;  %373 = vmatmul.f32.vlgmr.msra.gmra.mxu3 %v217_v46  ;;  %413 = vmatmul.f32.vlgmr.msrb.gmra.mxu1 %v217_v46 }
 0x122   :  { %v211_v48 = vadd.f32 %v210_v47, %v170_v45 }
 0x124   :  { %vm214_vm3 = vcmp.ge.f32.partialorder %v211_v48, 0.0  ;;  %v216_v49 = vmul.f32 0.01, %v211_v48 }
 0x126   :  { %v218_v50 = vsel %vm214_vm3, %v211_v48, %v216_v49 }
 0x127   :  { %393 = vmatmul.f32.vlgmr.msrb.gmra.mxu0 %v218_v50  ;;  %433 = vmatmul.f32.vlgmr.msrb.gmra.mxu2 %v218_v50 }
 0x129   :  { %453 = vmatmul.f32.vlgmr.msrb.gmra.mxu3 %v217_v46  ;;  %493 = vmatmul.f32.vlgmr.msra.gmra.mxu1 %v217_v46 }
 0x12f   :  { %473 = vmatmul.f32.vlgmr.msra.gmra.mxu0 %v218_v50  ;;  %513 = vmatmul.f32.vlgmr.msra.gmra.mxu2 %v218_v50 }
 0x19e   :  { %v414_v53 = vpop.f32.mrf.mxu1 }
 0x19f   :  { %v415_v59 = vadd.f32 %v414_v53, %v350_v56 }
 0x1a4   :  { %v374_v54 = vpop.f32.mrf.mxu3  ;;  %v394_v55 = vpop.f32.mrf.mxu0 }
 0x1a5   :  { %v375_v57 = vadd.f32 %v374_v54, %v349_v52 }
 0x1a6   :  { %v494_v2 = vpop.f32.mrf.mxu1 }
 0x1a7   :  { %v395_v58 = vadd.f32 %v394_v55, %v375_v57  ;;  %v495_v5 = vadd.f32 %v494_v2, %v352_v0 }
 0x1a9   :  { %517 = vst [vmem:[#allocation11] sm:$0xff] %v395_v58 }
 0x1aa   :  { %v434_v61 = vpop.f32.mrf.mxu2 }
 0x1ab   :  { %v435_v62 = vadd.f32 %v434_v61, %v415_v59 }
 0x1ac   :  { %v454_v63 = vpop.f32.mrf.mxu3  ;;  %v474_v3 = vpop.f32.mrf.mxu0 }
 0x1ad   :  { %518 = vst [vmem:[#allocation11 + $0x8] sm:$0xff] %v435_v62  ;;  %v455_v1 = vadd.f32 %v454_v63, %v351_v60 }
 0x1af   :  { %v475_v4 = vadd.f32 %v474_v3, %v455_v1 }
 0x1b1   :  { %519 = vst [vmem:[#allocation11 + $0x10] sm:$0xff] %v475_v4 }
 0x1b2   :  { %v514_v6 = vpop.f32.mrf.mxu2 }
 0x1b3   :  { %v515_v7 = vadd.f32 %v514_v6, %v495_v5 }
 0x1b5   :  { %520 = vst [vmem:[#allocation11 + $0x18] sm:$0xff] %v515_v7 }
 0x1b6   :  { %531 = dma.vmem_to_hbm [thread:$0]  %s527_s30, 512, %s529_s10, [#allocation4]  }
 0x1b7   :  { %704 = dma.done.wait [#allocation4], 512  }
 0x1b8   :  { %705 = vsyncadd [#allocation4], 4294966784 }
 0x1b9   :  { %536 = vsyncpa [#allocation3], 1 }
 0x1ba   :  { %537 = vsyncpa [#allocation6], 1 }
 0x1bb   :  { %538 = vsyncpa [#allocation9], 1 }
 0x1bc   :  { %539 = vsyncpa [#allocation4], 1 }

</bundles_post_ra>
